<compile_context>
chip_gen: v6e
topology: v6e:2x2x1
jax: 0.10.0
libtpu: 0.0.40
codegen_flags: <defaults>
</compile_context>

<pallas_src>
import math
import functools

import jax
import jax.numpy as jnp
from jax.experimental import pallas as pl
from jax.experimental.pallas import tpu as pltpu


def _layernorm(x, w, b, eps=1e-5):
    mu = jnp.mean(x, axis=-1, keepdims=True)
    var = jnp.mean((x - mu) ** 2, axis=-1, keepdims=True)
    return (x - mu) * jax.lax.rsqrt(var + eps) * w + b


def _gelu_exact(x):
    # torch.nn.functional.gelu default (erf-based)
    return 0.5 * x * (1.0 + jax.lax.erf(x * (1.0 / math.sqrt(2.0))))


def unimol_fused_kernel(x_ref, edge_ref,
                        ln1w_ref, ln1b_ref, win_ref, bin_ref,
                        wout_ref, bout_ref, ln2w_ref, ln2b_ref,
                        w1_ref, b1_ref, w2_ref, b2_ref,
                        x_out_ref, edge_out_ref, *, num_heads):
    layer = pl.program_id(1)
    last_layer = pl.num_programs(1) - 1

    # Layer 0 of each batch block: seed the VMEM-resident running state from HBM.
    @pl.when(layer == 0)
    def _():
        x_out_ref[...] = x_ref[...]
        edge_out_ref[...] = edge_ref[...]

    xb = x_out_ref[...]                        # (bb, L, D) f32 running hidden state
    bb, L, D = xb.shape
    H = num_heads
    Dh = D // H
    G = bb * H

    x_res = xb.reshape(bb * L, D)

    # ---------------- self-attention block (pre-LN) ----------------
    xn = _layernorm(x_res, ln1w_ref[0], ln1b_ref[0])
    qkv = jnp.dot(xn.astype(jnp.bfloat16), win_ref[0],
                  preferred_element_type=jnp.float32) + bin_ref[0]
    # 1/sqrt(Dh) is already folded into the Q columns of win / bin.
    q = qkv[:, 0 * D:1 * D]
    k = qkv[:, 1 * D:2 * D]
    v = qkv[:, 2 * D:3 * D]

    def to_heads(t2):                          # (bb*L, D) -> (bb*H, L, Dh)
        t3 = t2.reshape(bb, L, D)
        hs = [t3[:, :, h * Dh:(h + 1) * Dh] for h in range(H)]
        return jnp.stack(hs, axis=1).reshape(G, L, Dh)

    qh = to_heads(q).astype(jnp.bfloat16)      # cast only at MXU boundaries
    kh = to_heads(k).astype(jnp.bfloat16)
    vh = to_heads(v).astype(jnp.bfloat16)

    edge = edge_out_ref[...].reshape(G, L, L)  # f32 running edge state

    # batched QK^T on the MXU (scale already folded into q), plus edge bias
    logits = jnp.einsum('gld,gmd->glm', qh, kh,
                        preferred_element_type=jnp.float32) + edge

    # edge update: edge_tunnel(edge_layers=[]) is identity -> new edge = t + edge
    edge_out_ref[...] = logits.reshape(bb, H, L, L)

    @pl.when(layer == last_layer)
    def _():
        # fused no_zero_fill_pad=False handling: masked_fill_(isinf, 0.0) applied
        # only to the final returned apairs (each layer's softmax still sees -inf).
        e = edge_out_ref[...]
        edge_out_ref[...] = jnp.where(jnp.isinf(e), 0.0, e)

    # softmax along the last axis; normalisation deferred past the PV matmul
    m = jnp.max(logits, axis=-1, keepdims=True)
    p = jnp.exp(logits - m)
    denom = jnp.sum(p, axis=-1, keepdims=True)              # (G, L, 1) f32
    o = jnp.einsum('glm,gmd->gld', p.astype(jnp.bfloat16), vh,
                   preferred_element_type=jnp.float32)       # (G, L, Dh)
    o = o * pl.reciprocal(denom, approx=True)

    o4 = o.reshape(bb, H, L, Dh)
    attn = jnp.concatenate([o4[:, h] for h in range(H)], axis=-1)   # (bb, L, D)
    attn = attn.reshape(bb * L, D)
    attn = jnp.dot(attn.astype(jnp.bfloat16), wout_ref[0],
                   preferred_element_type=jnp.float32) + bout_ref[0]
    x1 = x_res + attn                          # residual (dropout is eval no-op)

    # ---------------- feed-forward block (pre-LN) ----------------
    xn2 = _layernorm(x1, ln2w_ref[0], ln2b_ref[0])
    hid = jnp.dot(xn2.astype(jnp.bfloat16), w1_ref[0],
                  preferred_element_type=jnp.float32) + b1_ref[0]
    hid = _gelu_exact(hid)
    ff = jnp.dot(hid.astype(jnp.bfloat16), w2_ref[0],
                 preferred_element_type=jnp.float32) + b2_ref[0]
    x2 = x1 + ff

    x_out_ref[...] = x2.reshape(bb, L, D).astype(x_out_ref.dtype)


def _physical_vmem_bytes():
    try:
        return int(pltpu.get_tpu_info().vmem_capacity_bytes)
    except Exception:
        return 64 * 1024 * 1024        # conservative default (v7x per-TC VMEM)


def _pick_batch_block(B, H, L, D, dff, per_layer_weight_bytes, vmem_bytes):
    """Pick the number of batch items packed per grid step.

    Peak VMEM per grid step is roughly:
      edge: 2x input + 2x output pipeline buffers + ~3 live (H,L,L) f32 slabs
      x:    2x in + 2x out buffers + ~4 live (L, max(D,dff)) f32 temporaries
      weights: double-buffered bf16 stream for one layer
    """
    budget = int(vmem_bytes * 0.8) - 2 * per_layer_weight_bytes
    edge_item = 7 * H * L * L * 4
    x_item = 8 * L * max(D, dff) * 4
    per_item = edge_item + x_item
    bb = max(1, min(B, max(budget, per_item) // per_item))
    if B >= 2:
        # keep >=2 grid steps on the "parallel" axis so both TensorCores of a
        # 2-core chip (v7x) get work; cheap on 1-core chips.
        bb = max(1, min(bb, B // 2))
    while B % bb:
        bb -= 1
    return bb


def run_encoder(x_bld, edge_bhll, params, num_heads, *,
                batch_block=None, vmem_limit_bytes=None):
    """x_bld: (B, L, D) f32; edge_bhll: (B, H, L, L) f32;
    params: dict of per-layer weights stacked on a leading n_layer axis."""
    B, L, D = x_bld.shape
    H = num_heads
    assert edge_bhll.shape == (B, H, L, L)
    n_layer = params["win"].shape[0]
    dff = params["w1"].shape[-1]

    weight_args = (params["ln1w"], params["ln1b"],
                   params["win"], params["bin"],
                   params["wout"], params["bout"],
                   params["ln2w"], params["ln2b"],
                   params["w1"], params["b1"],
                   params["w2"], params["b2"])

    per_layer_weight_bytes = sum(
        (int(a.size) // n_layer) * a.dtype.itemsize for a in weight_args)

    phys_vmem = _physical_vmem_bytes()
    if vmem_limit_bytes is None:
        vmem_limit_bytes = int(phys_vmem * 0.9)
    bb = (_pick_batch_block(B, H, L, D, dff, per_layer_weight_bytes, phys_vmem)
          if batch_block is None else batch_block)
    assert B % bb == 0

    def stacked_spec(a):
        nd = a.ndim
        return pl.BlockSpec((1,) + a.shape[1:],
                            lambda b, l, _nd=nd: (l,) + (0,) * (_nd - 1))

    grid_spec = pltpu.PrefetchScalarGridSpec(
        num_scalar_prefetch=0,
        grid=(B // bb, n_layer),
        in_specs=[pl.BlockSpec((bb, L, D), lambda b, l: (b, 0, 0)),
                  pl.BlockSpec((bb, H, L, L), lambda b, l: (b, 0, 0, 0))]
                 + [stacked_spec(a) for a in weight_args],
        out_specs=[pl.BlockSpec((bb, L, D), lambda b, l: (b, 0, 0)),
                   pl.BlockSpec((bb, H, L, L), lambda b, l: (b, 0, 0, 0))],
    )

    kernel = functools.partial(unimol_fused_kernel, num_heads=num_heads)
    x_out, edge_out = pl.pallas_call(
        kernel,
        grid_spec=grid_spec,
        out_shape=(jax.ShapeDtypeStruct((B, L, D), jnp.float32),
                   jax.ShapeDtypeStruct((B, H, L, L), jnp.float32)),
        # x and (largest) edge tensors reuse their HBM buffers for the outputs.
        input_output_aliases={0: 0, 1: 1},
        compiler_params=pltpu.CompilerParams(
            dimension_semantics=("parallel", "arbitrary"),
            vmem_limit_bytes=vmem_limit_bytes),
    )(x_bld, edge_bhll, *weight_args)
    return x_out, edge_out


def unimol_encoder2(atoms_emb, apairs, stacked_params, num_heads):
    """atoms_emb: (L, B, D) float; apairs: (B, H, L, L) float.
    Returns (atoms_emb (L, B, D), apairs (B, L, L, H))."""
    x = jnp.transpose(atoms_emb, (1, 0, 2))            # -> (B, L, D)
    x_out, edge_out = run_encoder(x, apairs, stacked_params, num_heads)
    atoms_out = jnp.transpose(x_out, (1, 0, 2))         # -> (L, B, D)
    apairs_out = jnp.transpose(edge_out, (0, 2, 3, 1))  # -> (B, L, L, H)
    return atoms_out, apairs_out


def init_layer_params(key, embed_dim, num_heads, d_ff_factor=4):
    """Deterministic nn.Linear-style init; MXU weights stored pre-transposed
    (fan_in, fan_out) in bf16 with the 1/sqrt(head_dim) attention scale folded
    into the Q third of in_proj; biases and LN params in f32."""
    dff = embed_dim * d_ff_factor
    head_dim = embed_dim // num_heads

    def linear(k, fan_in, fan_out):
        kw, kb = jax.random.split(k)
        bound = 1.0 / math.sqrt(fan_in)
        w = jax.random.uniform(kw, (fan_in, fan_out), jnp.float32, -bound, bound)
        b = jax.random.uniform(kb, (1, fan_out), jnp.float32, -bound, bound)
        return w, b

    k_in, k_out, k1, k2 = jax.random.split(key, 4)
    win, bin_ = linear(k_in, embed_dim, 3 * embed_dim)
    scale = 1.0 / math.sqrt(head_dim)
    win = win.at[:, :embed_dim].multiply(scale)
    bin_ = bin_.at[:, :embed_dim].multiply(scale)
    wout, bout = linear(k_out, embed_dim, embed_dim)
    w1, b1 = linear(k1, embed_dim, dff)
    w2, b2 = linear(k2, dff, embed_dim)
    ones = jnp.ones((1, embed_dim), jnp.float32)
    zeros = jnp.zeros((1, embed_dim), jnp.float32)
    return {"ln1w": ones, "ln1b": zeros,
            "win": win.astype(jnp.bfloat16), "bin": bin_,
            "wout": wout.astype(jnp.bfloat16), "bout": bout,
            "ln2w": ones, "ln2b": zeros,
            "w1": w1.astype(jnp.bfloat16), "b1": b1,
            "w2": w2.astype(jnp.bfloat16), "b2": b2}


def stack_layer_params(layer_params):
    """Stack a list of per-layer param dicts along a new leading n_layer axis."""
    return {k: jnp.stack([p[k] for p in layer_params], axis=0)
            for k in layer_params[0]}


if __name__ == "__main__":
    # small shapes: L=8, B=2, D=32, H=4 (head_dim=8), n_layer=2
    L, B, D, H, N_LAYER = 8, 2, 32, 4, 2

    key = jax.random.PRNGKey(0)
    k_x, k_e, k_p = jax.random.split(key, 3)
    atoms_emb = jax.random.normal(k_x, (L, B, D), jnp.float32)
    apairs = 0.1 * jax.random.normal(k_e, (B, H, L, L), jnp.float32)

    layer_keys = jax.random.split(k_p, N_LAYER)
    stacked_params = stack_layer_params(
        [init_layer_params(lk, D, H) for lk in layer_keys])

    encoder = jax.jit(functools.partial(unimol_encoder2, num_heads=H))
    atoms_out, apairs_out = encoder(atoms_emb, apairs, stacked_params)
    jax.block_until_ready((atoms_out, apairs_out))

    assert atoms_out.shape == (L, B, D)
    assert apairs_out.shape == (B, L, L, H)
    assert bool(jnp.isfinite(atoms_out).all())
    assert bool(jnp.isfinite(apairs_out).all())
    # TODO(synk): 'pe'/'peee' layer variants, non-empty edge_layers, dropout
    #             (eval-mode no-op) and output_delta_apairs are not exercised.
    print("KERNEL_OK")
</pallas_src>

<mosaic_0001>
module attributes {stable_mosaic.version = 11 : i64} {
  func.func @unimol_fused_kernel(%arg0: i32, %arg1: i32, %arg2: memref<1x8x32xf32, #tpu.memory_space<vmem>>, %arg3: memref<1x4x8x8xf32, #tpu.memory_space<vmem>>, %arg4: memref<1x1x32xf32, #tpu.memory_space<vmem>>, %arg5: memref<1x1x32xf32, #tpu.memory_space<vmem>>, %arg6: memref<1x32x96xbf16, #tpu.memory_space<vmem>>, %arg7: memref<1x1x96xf32, #tpu.memory_space<vmem>>, %arg8: memref<1x32x32xbf16, #tpu.memory_space<vmem>>, %arg9: memref<1x1x32xf32, #tpu.memory_space<vmem>>, %arg10: memref<1x1x32xf32, #tpu.memory_space<vmem>>, %arg11: memref<1x1x32xf32, #tpu.memory_space<vmem>>, %arg12: memref<1x32x128xbf16, #tpu.memory_space<vmem>>, %arg13: memref<1x1x128xf32, #tpu.memory_space<vmem>>, %arg14: memref<1x128x32xbf16, #tpu.memory_space<vmem>>, %arg15: memref<1x1x32xf32, #tpu.memory_space<vmem>>, %arg16: memref<1x8x32xf32, #tpu.memory_space<vmem>>, %arg17: memref<1x4x8x8xf32, #tpu.memory_space<vmem>>) attributes {dimension_semantics = [#tpu.dimension_semantics<parallel>, #tpu.dimension_semantics<arbitrary>], iteration_bounds = array<i64: 2, 2>, scalar_prefetch = 0 : i64, scratch_operands = 0 : i64, tpu.core_type = #tpu.core_type<tc>, window_params = [{transform_indices = @transform_0, window_bounds = array<i64: 1, 8, 32>}, {transform_indices = @transform_1, window_bounds = array<i64: 1, 4, 8, 8>}, {transform_indices = @transform_2, window_bounds = array<i64: 1, 1, 32>}, {transform_indices = @transform_3, window_bounds = array<i64: 1, 1, 32>}, {transform_indices = @transform_4, window_bounds = array<i64: 1, 32, 96>}, {transform_indices = @transform_5, window_bounds = array<i64: 1, 1, 96>}, {transform_indices = @transform_6, window_bounds = array<i64: 1, 32, 32>}, {transform_indices = @transform_7, window_bounds = array<i64: 1, 1, 32>}, {transform_indices = @transform_8, window_bounds = array<i64: 1, 1, 32>}, {transform_indices = @transform_9, window_bounds = array<i64: 1, 1, 32>}, {transform_indices = @transform_10, window_bounds = array<i64: 1, 32, 128>}, {transform_indices = @transform_11, window_bounds = array<i64: 1, 1, 128>}, {transform_indices = @transform_12, window_bounds = array<i64: 1, 128, 32>}, {transform_indices = @transform_13, window_bounds = array<i64: 1, 1, 32>}, {transform_indices = @transform_14, window_bounds = array<i64: 1, 8, 32>}, {transform_indices = @transform_15, window_bounds = array<i64: 1, 4, 8, 8>}]} {
    %c0_i32 = arith.constant 0 : i32
    %0 = arith.cmpi eq, %arg1, %c0_i32 : i32
    %1 = arith.extui %0 : i1 to i32
    %c0_i32_0 = arith.constant 0 : i32
    %2 = arith.cmpi ne, %1, %c0_i32_0 : i32
    scf.if %2 {
      %c0_71 = arith.constant 0 : index
      %c0_72 = arith.constant 0 : index
      %c0_73 = arith.constant 0 : index
      %172 = vector.load %arg2[%c0_71, %c0_72, %c0_73] : memref<1x8x32xf32, #tpu.memory_space<vmem>>, vector<1x8x32xf32>
      %c0_74 = arith.constant 0 : index
      %c0_75 = arith.constant 0 : index
      %c0_76 = arith.constant 0 : index
      %173 = vector.load %arg16[%c0_74, %c0_75, %c0_76] : memref<1x8x32xf32, #tpu.memory_space<vmem>>, vector<1x8x32xf32>
      tpu.vector_store %arg16[%c0_74, %c0_75, %c0_76], %172 {strides = array<i32>} : memref<1x8x32xf32, #tpu.memory_space<vmem>>, vector<1x8x32xf32>,
      %c0_77 = arith.constant 0 : index
      %c0_78 = arith.constant 0 : index
      %c0_79 = arith.constant 0 : index
      %c0_80 = arith.constant 0 : index
      %174 = vector.load %arg3[%c0_77, %c0_78, %c0_79, %c0_80] : memref<1x4x8x8xf32, #tpu.memory_space<vmem>>, vector<1x4x8x8xf32>
      %c0_81 = arith.constant 0 : index
      %c0_82 = arith.constant 0 : index
      %c0_83 = arith.constant 0 : index
      %c0_84 = arith.constant 0 : index
      %175 = vector.load %arg17[%c0_81, %c0_82, %c0_83, %c0_84] : memref<1x4x8x8xf32, #tpu.memory_space<vmem>>, vector<1x4x8x8xf32>
      tpu.vector_store %arg17[%c0_81, %c0_82, %c0_83, %c0_84], %174 {strides = array<i32>} : memref<1x4x8x8xf32, #tpu.memory_space<vmem>>, vector<1x4x8x8xf32>,
    } else {
    }
    %c0 = arith.constant 0 : index
    %c0_1 = arith.constant 0 : index
    %c0_2 = arith.constant 0 : index
    %3 = vector.load %arg16[%c0, %c0_1, %c0_2] : memref<1x8x32xf32, #tpu.memory_space<vmem>>, vector<1x8x32xf32>
    %4 = vector.shape_cast %3 : vector<1x8x32xf32> to vector<8x32xf32>
    %c0_3 = arith.constant 0 : index
    %c0_4 = arith.constant 0 : index
    %c0_5 = arith.constant 0 : index
    %5 = vector.load %arg4[%c0_3, %c0_4, %c0_5] : memref<1x1x32xf32, #tpu.memory_space<vmem>>, vector<1x1x32xf32>
    %6 = vector.shape_cast %5 : vector<1x1x32xf32> to vector<1x32xf32>
    %c0_6 = arith.constant 0 : index
    %c0_7 = arith.constant 0 : index
    %c0_8 = arith.constant 0 : index
    %7 = vector.load %arg5[%c0_6, %c0_7, %c0_8] : memref<1x1x32xf32, #tpu.memory_space<vmem>>, vector<1x1x32xf32>
    %8 = vector.shape_cast %7 : vector<1x1x32xf32> to vector<1x32xf32>
    %cst = arith.constant dense<0.000000e+00> : vector<8xf32>
    %9 = vector.multi_reduction <add>, %4, %cst [1] : vector<8x32xf32> to vector<8xf32>
    %10 = vector.shape_cast %9 : vector<8xf32> to vector<8x1xf32>
    %cst_9 = arith.constant 3.200000e+01 : f32
    %11 = vector.broadcast %cst_9 : f32 to vector<8x1xf32>
    %12 = arith.divf %10, %11 : vector<8x1xf32>
    %13 = vector.broadcast %12 : vector<8x1xf32> to vector<8x32xf32>
    %14 = arith.subf %4, %13 : vector<8x32xf32>
    %15 = arith.mulf %14, %14 : vector<8x32xf32>
    %cst_10 = arith.constant dense<0.000000e+00> : vector<8xf32>
    %16 = vector.multi_reduction <add>, %15, %cst_10 [1] : vector<8x32xf32> to vector<8xf32>
    %17 = vector.shape_cast %16 : vector<8xf32> to vector<8x1xf32>
    %cst_11 = arith.constant 3.200000e+01 : f32
    %18 = vector.broadcast %cst_11 : f32 to vector<8x1xf32>
    %19 = arith.divf %17, %18 : vector<8x1xf32>
    %20 = vector.broadcast %12 : vector<8x1xf32> to vector<8x32xf32>
    %21 = arith.subf %4, %20 : vector<8x32xf32>
    %cst_12 = arith.constant 9.99999974E-6 : f32
    %22 = vector.broadcast %cst_12 : f32 to vector<8x1xf32>
    %23 = arith.addf %19, %22 : vector<8x1xf32>
    %24 = math.rsqrt %23 : vector<8x1xf32>
    %25 = vector.broadcast %24 : vector<8x1xf32> to vector<8x32xf32>
    %26 = arith.mulf %21, %25 : vector<8x32xf32>
    %27 = vector.broadcast %6 : vector<1x32xf32> to vector<8x32xf32>
    %28 = arith.mulf %26, %27 : vector<8x32xf32>
    %29 = vector.broadcast %8 : vector<1x32xf32> to vector<8x32xf32>
    %30 = arith.addf %28, %29 : vector<8x32xf32>
    %31 = arith.truncf %30 : vector<8x32xf32> to vector<8x32xbf16>
    %c0_13 = arith.constant 0 : index
    %c0_14 = arith.constant 0 : index
    %c0_15 = arith.constant 0 : index
    %32 = vector.load %arg6[%c0_13, %c0_14, %c0_15] : memref<1x32x96xbf16, #tpu.memory_space<vmem>>, vector<1x32x96xbf16>
    %33 = vector.shape_cast %32 : vector<1x32x96xbf16> to vector<32x96xbf16>
    %cst_16 = arith.constant dense<0.000000e+00> : vector<8x96xf32>
    %34 = tpu.matmul %31, %33, %cst_16 {dimension_numbers = #tpu.dot_dimension_numbers<[1], [0], [0], [1], [0, 0, 1, 1], [], []>} : vector<8x32xbf16>, vector<32x96xbf16>, vector<8x96xf32> -> vector<8x96xf32>
    %c0_17 = arith.constant 0 : index
    %c0_18 = arith.constant 0 : index
    %c0_19 = arith.constant 0 : index
    %35 = vector.load %arg7[%c0_17, %c0_18, %c0_19] : memref<1x1x96xf32, #tpu.memory_space<vmem>>, vector<1x1x96xf32>
    %36 = vector.shape_cast %35 : vector<1x1x96xf32> to vector<1x96xf32>
    %37 = vector.broadcast %36 : vector<1x96xf32> to vector<8x96xf32>
    %38 = arith.addf %34, %37 : vector<8x96xf32>
    %39 = vector.extract_strided_slice %38 {offsets = [0, 0], sizes = [8, 32], strides = [1, 1]} : vector<8x96xf32> to vector<8x32xf32>
    %40 = vector.extract_strided_slice %38 {offsets = [0, 32], sizes = [8, 32], strides = [1, 1]} : vector<8x96xf32> to vector<8x32xf32>
    %41 = vector.extract_strided_slice %38 {offsets = [0, 64], sizes = [8, 32], strides = [1, 1]} : vector<8x96xf32> to vector<8x32xf32>
    %42 = vector.shape_cast %39 : vector<8x32xf32> to vector<1x8x32xf32>
    %43 = vector.extract_strided_slice %42 {offsets = [0, 0, 0], sizes = [1, 8, 8], strides = [1, 1, 1]} : vector<1x8x32xf32> to vector<1x8x8xf32>
    %44 = vector.extract_strided_slice %42 {offsets = [0, 0, 8], sizes = [1, 8, 8], strides = [1, 1, 1]} : vector<1x8x32xf32> to vector<1x8x8xf32>
    %45 = vector.extract_strided_slice %42 {offsets = [0, 0, 16], sizes = [1, 8, 8], strides = [1, 1, 1]} : vector<1x8x32xf32> to vector<1x8x8xf32>
    %46 = vector.extract_strided_slice %42 {offsets = [0, 0, 24], sizes = [1, 8, 8], strides = [1, 1, 1]} : vector<1x8x32xf32> to vector<1x8x8xf32>
    %47 = vector.shape_cast %43 : vector<1x8x8xf32> to vector<1x1x8x8xf32>
    %48 = vector.shape_cast %44 : vector<1x8x8xf32> to vector<1x1x8x8xf32>
    %49 = vector.shape_cast %45 : vector<1x8x8xf32> to vector<1x1x8x8xf32>
    %50 = vector.shape_cast %46 : vector<1x8x8xf32> to vector<1x1x8x8xf32>
    %51 = tpu.concatenate %47, %48, %49, %50 in 1 : vector<1x1x8x8xf32>, vector<1x1x8x8xf32>, vector<1x1x8x8xf32>, vector<1x1x8x8xf32> -> vector<1x4x8x8xf32>
    %52 = vector.shape_cast %51 : vector<1x4x8x8xf32> to vector<4x8x8xf32>
    %53 = arith.truncf %52 : vector<4x8x8xf32> to vector<4x8x8xbf16>
    %54 = vector.shape_cast %40 : vector<8x32xf32> to vector<1x8x32xf32>
    %55 = vector.extract_strided_slice %54 {offsets = [0, 0, 0], sizes = [1, 8, 8], strides = [1, 1, 1]} : vector<1x8x32xf32> to vector<1x8x8xf32>
    %56 = vector.extract_strided_slice %54 {offsets = [0, 0, 8], sizes = [1, 8, 8], strides = [1, 1, 1]} : vector<1x8x32xf32> to vector<1x8x8xf32>
    %57 = vector.extract_strided_slice %54 {offsets = [0, 0, 16], sizes = [1, 8, 8], strides = [1, 1, 1]} : vector<1x8x32xf32> to vector<1x8x8xf32>
    %58 = vector.extract_strided_slice %54 {offsets = [0, 0, 24], sizes = [1, 8, 8], strides = [1, 1, 1]} : vector<1x8x32xf32> to vector<1x8x8xf32>
    %59 = vector.shape_cast %55 : vector<1x8x8xf32> to vector<1x1x8x8xf32>
    %60 = vector.shape_cast %56 : vector<1x8x8xf32> to vector<1x1x8x8xf32>
    %61 = vector.shape_cast %57 : vector<1x8x8xf32> to vector<1x1x8x8xf32>
    %62 = vector.shape_cast %58 : vector<1x8x8xf32> to vector<1x1x8x8xf32>
    %63 = tpu.concatenate %59, %60, %61, %62 in 1 : vector<1x1x8x8xf32>, vector<1x1x8x8xf32>, vector<1x1x8x8xf32>, vector<1x1x8x8xf32> -> vector<1x4x8x8xf32>
    %64 = vector.shape_cast %63 : vector<1x4x8x8xf32> to vector<4x8x8xf32>
    %65 = arith.truncf %64 : vector<4x8x8xf32> to vector<4x8x8xbf16>
    %66 = vector.shape_cast %41 : vector<8x32xf32> to vector<1x8x32xf32>
    %67 = vector.extract_strided_slice %66 {offsets = [0, 0, 0], sizes = [1, 8, 8], strides = [1, 1, 1]} : vector<1x8x32xf32> to vector<1x8x8xf32>
    %68 = vector.extract_strided_slice %66 {offsets = [0, 0, 8], sizes = [1, 8, 8], strides = [1, 1, 1]} : vector<1x8x32xf32> to vector<1x8x8xf32>
    %69 = vector.extract_strided_slice %66 {offsets = [0, 0, 16], sizes = [1, 8, 8], strides = [1, 1, 1]} : vector<1x8x32xf32> to vector<1x8x8xf32>
    %70 = vector.extract_strided_slice %66 {offsets = [0, 0, 24], sizes = [1, 8, 8], strides = [1, 1, 1]} : vector<1x8x32xf32> to vector<1x8x8xf32>
    %71 = vector.shape_cast %67 : vector<1x8x8xf32> to vector<1x1x8x8xf32>
    %72 = vector.shape_cast %68 : vector<1x8x8xf32> to vector<1x1x8x8xf32>
    %73 = vector.shape_cast %69 : vector<1x8x8xf32> to vector<1x1x8x8xf32>
    %74 = vector.shape_cast %70 : vector<1x8x8xf32> to vector<1x1x8x8xf32>
    %75 = tpu.concatenate %71, %72, %73, %74 in 1 : vector<1x1x8x8xf32>, vector<1x1x8x8xf32>, vector<1x1x8x8xf32>, vector<1x1x8x8xf32> -> vector<1x4x8x8xf32>
    %76 = vector.shape_cast %75 : vector<1x4x8x8xf32> to vector<4x8x8xf32>
    %77 = arith.truncf %76 : vector<4x8x8xf32> to vector<4x8x8xbf16>
    %c0_20 = arith.constant 0 : index
    %c0_21 = arith.constant 0 : index
    %c0_22 = arith.constant 0 : index
    %c0_23 = arith.constant 0 : index
    %78 = vector.load %arg17[%c0_20, %c0_21, %c0_22, %c0_23] : memref<1x4x8x8xf32, #tpu.memory_space<vmem>>, vector<1x4x8x8xf32>
    %79 = vector.shape_cast %78 : vector<1x4x8x8xf32> to vector<4x8x8xf32>
    "tpu.trace_start"() <{level = 10 : i32, message = "gld,gmd->glm"}> : () -> ()
    %cst_24 = arith.constant dense<0.000000e+00> : vector<4x8x8xf32>
    %80 = tpu.matmul %53, %65, %cst_24 {dimension_numbers = #tpu.dot_dimension_numbers<[2], [2], [1], [1], [0, 0, 0, 1, 1, 1], [0], [0]>} : vector<4x8x8xbf16>, vector<4x8x8xbf16>, vector<4x8x8xf32> -> vector<4x8x8xf32>
    "tpu.trace_stop"() : () -> ()
    %81 = arith.addf %80, %79 : vector<4x8x8xf32>
    %82 = vector.shape_cast %81 : vector<4x8x8xf32> to vector<1x4x8x8xf32>
    %c0_25 = arith.constant 0 : index
    %c0_26 = arith.constant 0 : index
    %c0_27 = arith.constant 0 : index
    %c0_28 = arith.constant 0 : index
    %83 = vector.load %arg17[%c0_25, %c0_26, %c0_27, %c0_28] : memref<1x4x8x8xf32, #tpu.memory_space<vmem>>, vector<1x4x8x8xf32>
    tpu.vector_store %arg17[%c0_25, %c0_26, %c0_27, %c0_28], %82 {strides = array<i32>} : memref<1x4x8x8xf32, #tpu.memory_space<vmem>>, vector<1x4x8x8xf32>,
    %c1_i32 = arith.constant 1 : i32
    %84 = arith.cmpi eq, %arg1, %c1_i32 : i32
    %85 = arith.extui %84 : i1 to i32
    %c0_i32_29 = arith.constant 0 : i32
    %86 = arith.cmpi ne, %85, %c0_i32_29 : i32
    scf.if %86 {
      %c0_71 = arith.constant 0 : index
      %c0_72 = arith.constant 0 : index
      %c0_73 = arith.constant 0 : index
      %c0_74 = arith.constant 0 : index
      %172 = vector.load %arg17[%c0_71, %c0_72, %c0_73, %c0_74] : memref<1x4x8x8xf32, #tpu.memory_space<vmem>>, vector<1x4x8x8xf32>
      %173 = math.absf %172 : vector<1x4x8x8xf32>
      %cst_75 = arith.constant 0x7F800000 : f32
      %174 = vector.broadcast %cst_75 : f32 to vector<1x4x8x8xf32>
      %175 = arith.cmpf oeq, %173, %174 : vector<1x4x8x8xf32>
      %cst_76 = arith.constant 0.000000e+00 : f32
      %176 = vector.broadcast %cst_76 : f32 to vector<1x4x8x8xf32>
      %177 = arith.select %175, %176, %172 : vector<1x4x8x8xi1>, vector<1x4x8x8xf32>
      %c0_77 = arith.constant 0 : index
      %c0_78 = arith.constant 0 : index
      %c0_79 = arith.constant 0 : index
      %c0_80 = arith.constant 0 : index
      %178 = vector.load %arg17[%c0_77, %c0_78, %c0_79, %c0_80] : memref<1x4x8x8xf32, #tpu.memory_space<vmem>>, vector<1x4x8x8xf32>
      tpu.vector_store %arg17[%c0_77, %c0_78, %c0_79, %c0_80], %177 {strides = array<i32>} : memref<1x4x8x8xf32, #tpu.memory_space<vmem>>, vector<1x4x8x8xf32>,
    } else {
    }
    %cst_30 = arith.constant dense<0xFF800000> : vector<4x8xf32>
    %87 = vector.multi_reduction <maximumf>, %81, %cst_30 [2] : vector<4x8x8xf32> to vector<4x8xf32>
    %88 = vector.shape_cast %87 : vector<4x8xf32> to vector<4x8x1xf32>
    %89 = vector.broadcast %88 : vector<4x8x1xf32> to vector<4x8x8xf32>
    %90 = arith.subf %81, %89 : vector<4x8x8xf32>
    %91 = math.exp %90 : vector<4x8x8xf32>
    %cst_31 = arith.constant dense<0.000000e+00> : vector<4x8xf32>
    %92 = vector.multi_reduction <add>, %91, %cst_31 [2] : vector<4x8x8xf32> to vector<4x8xf32>
    %93 = vector.shape_cast %92 : vector<4x8xf32> to vector<4x8x1xf32>
    %94 = arith.truncf %91 : vector<4x8x8xf32> to vector<4x8x8xbf16>
    "tpu.trace_start"() <{level = 10 : i32, message = "glm,gmd->gld"}> : () -> ()
    %cst_32 = arith.constant dense<0.000000e+00> : vector<4x8x8xf32>
    %95 = tpu.matmul %94, %77, %cst_32 {dimension_numbers = #tpu.dot_dimension_numbers<[2], [1], [1], [2], [0, 0, 0, 1, 1, 2], [0], [0]>} : vector<4x8x8xbf16>, vector<4x8x8xbf16>, vector<4x8x8xf32> -> vector<4x8x8xf32>
    "tpu.trace_stop"() : () -> ()
    %96 = tpu.reciprocal %93 {approx = true} : vector<4x8x1xf32> -> vector<4x8x1xf32>
    %97 = vector.broadcast %96 : vector<4x8x1xf32> to vector<4x8x8xf32>
    %98 = arith.mulf %95, %97 : vector<4x8x8xf32>
    %99 = vector.shape_cast %98 : vector<4x8x8xf32> to vector<1x4x8x8xf32>
    %100 = vector.extract_strided_slice %99 {offsets = [0, 0, 0, 0], sizes = [1, 1, 8, 8], strides = [1, 1, 1, 1]} : vector<1x4x8x8xf32> to vector<1x1x8x8xf32>
    %101 = vector.shape_cast %100 : vector<1x1x8x8xf32> to vector<1x8x8xf32>
    %102 = vector.extract_strided_slice %99 {offsets = [0, 1, 0, 0], sizes = [1, 1, 8, 8], strides = [1, 1, 1, 1]} : vector<1x4x8x8xf32> to vector<1x1x8x8xf32>
    %103 = vector.shape_cast %102 : vector<1x1x8x8xf32> to vector<1x8x8xf32>
    %104 = vector.extract_strided_slice %99 {offsets = [0, 2, 0, 0], sizes = [1, 1, 8, 8], strides = [1, 1, 1, 1]} : vector<1x4x8x8xf32> to vector<1x1x8x8xf32>
    %105 = vector.shape_cast %104 : vector<1x1x8x8xf32> to vector<1x8x8xf32>
    %106 = vector.extract_strided_slice %99 {offsets = [0, 3, 0, 0], sizes = [1, 1, 8, 8], strides = [1, 1, 1, 1]} : vector<1x4x8x8xf32> to vector<1x1x8x8xf32>
    %107 = vector.shape_cast %106 : vector<1x1x8x8xf32> to vector<1x8x8xf32>
    %108 = tpu.concatenate %101, %103, %105, %107 in 2 : vector<1x8x8xf32>, vector<1x8x8xf32>, vector<1x8x8xf32>, vector<1x8x8xf32> -> vector<1x8x32xf32>
    %109 = vector.shape_cast %108 : vector<1x8x32xf32> to vector<8x32xf32>
    %110 = arith.truncf %109 : vector<8x32xf32> to vector<8x32xbf16>
    %c0_33 = arith.constant 0 : index
    %c0_34 = arith.constant 0 : index
    %c0_35 = arith.constant 0 : index
    %111 = vector.load %arg8[%c0_33, %c0_34, %c0_35] : memref<1x32x32xbf16, #tpu.memory_space<vmem>>, vector<1x32x32xbf16>
    %112 = vector.shape_cast %111 : vector<1x32x32xbf16> to vector<32x32xbf16>
    %cst_36 = arith.constant dense<0.000000e+00> : vector<8x32xf32>
    %113 = tpu.matmul %110, %112, %cst_36 {dimension_numbers = #tpu.dot_dimension_numbers<[1], [0], [0], [1], [0, 0, 1, 1], [], []>} : vector<8x32xbf16>, vector<32x32xbf16>, vector<8x32xf32> -> vector<8x32xf32>
    %c0_37 = arith.constant 0 : index
    %c0_38 = arith.constant 0 : index
    %c0_39 = arith.constant 0 : index
    %114 = vector.load %arg9[%c0_37, %c0_38, %c0_39] : memref<1x1x32xf32, #tpu.memory_space<vmem>>, vector<1x1x32xf32>
    %115 = vector.shape_cast %114 : vector<1x1x32xf32> to vector<1x32xf32>
    %116 = vector.broadcast %115 : vector<1x32xf32> to vector<8x32xf32>
    %117 = arith.addf %113, %116 : vector<8x32xf32>
    %118 = arith.addf %4, %117 : vector<8x32xf32>
    %c0_40 = arith.constant 0 : index
    %c0_41 = arith.constant 0 : index
    %c0_42 = arith.constant 0 : index
    %119 = vector.load %arg10[%c0_40, %c0_41, %c0_42] : memref<1x1x32xf32, #tpu.memory_space<vmem>>, vector<1x1x32xf32>
    %120 = vector.shape_cast %119 : vector<1x1x32xf32> to vector<1x32xf32>
    %c0_43 = arith.constant 0 : index
    %c0_44 = arith.constant 0 : index
    %c0_45 = arith.constant 0 : index
    %121 = vector.load %arg11[%c0_43, %c0_44, %c0_45] : memref<1x1x32xf32, #tpu.memory_space<vmem>>, vector<1x1x32xf32>
    %122 = vector.shape_cast %121 : vector<1x1x32xf32> to vector<1x32xf32>
    %cst_46 = arith.constant dense<0.000000e+00> : vector<8xf32>
    %123 = vector.multi_reduction <add>, %118, %cst_46 [1] : vector<8x32xf32> to vector<8xf32>
    %124 = vector.shape_cast %123 : vector<8xf32> to vector<8x1xf32>
    %cst_47 = arith.constant 3.200000e+01 : f32
    %125 = vector.broadcast %cst_47 : f32 to vector<8x1xf32>
    %126 = arith.divf %124, %125 : vector<8x1xf32>
    %127 = vector.broadcast %126 : vector<8x1xf32> to vector<8x32xf32>
    %128 = arith.subf %118, %127 : vector<8x32xf32>
    %129 = arith.mulf %128, %128 : vector<8x32xf32>
    %cst_48 = arith.constant dense<0.000000e+00> : vector<8xf32>
    %130 = vector.multi_reduction <add>, %129, %cst_48 [1] : vector<8x32xf32> to vector<8xf32>
    %131 = vector.shape_cast %130 : vector<8xf32> to vector<8x1xf32>
    %cst_49 = arith.constant 3.200000e+01 : f32
    %132 = vector.broadcast %cst_49 : f32 to vector<8x1xf32>
    %133 = arith.divf %131, %132 : vector<8x1xf32>
    %134 = vector.broadcast %126 : vector<8x1xf32> to vector<8x32xf32>
    %135 = arith.subf %118, %134 : vector<8x32xf32>
    %cst_50 = arith.constant 9.99999974E-6 : f32
    %136 = vector.broadcast %cst_50 : f32 to vector<8x1xf32>
    %137 = arith.addf %133, %136 : vector<8x1xf32>
    %138 = math.rsqrt %137 : vector<8x1xf32>
    %139 = vector.broadcast %138 : vector<8x1xf32> to vector<8x32xf32>
    %140 = arith.mulf %135, %139 : vector<8x32xf32>
    %141 = vector.broadcast %120 : vector<1x32xf32> to vector<8x32xf32>
    %142 = arith.mulf %140, %141 : vector<8x32xf32>
    %143 = vector.broadcast %122 : vector<1x32xf32> to vector<8x32xf32>
    %144 = arith.addf %142, %143 : vector<8x32xf32>
    %145 = arith.truncf %144 : vector<8x32xf32> to vector<8x32xbf16>
    %c0_51 = arith.constant 0 : index
    %c0_52 = arith.constant 0 : index
    %c0_53 = arith.constant 0 : index
    %146 = vector.load %arg12[%c0_51, %c0_52, %c0_53] : memref<1x32x128xbf16, #tpu.memory_space<vmem>>, vector<1x32x128xbf16>
    %147 = vector.shape_cast %146 : vector<1x32x128xbf16> to vector<32x128xbf16>
    %cst_54 = arith.constant dense<0.000000e+00> : vector<8x128xf32>
    %148 = tpu.matmul %145, %147, %cst_54 {dimension_numbers = #tpu.dot_dimension_numbers<[1], [0], [0], [1], [0, 0, 1, 1], [], []>} : vector<8x32xbf16>, vector<32x128xbf16>, vector<8x128xf32> -> vector<8x128xf32>
    %c0_55 = arith.constant 0 : index
    %c0_56 = arith.constant 0 : index
    %c0_57 = arith.constant 0 : index
    %149 = vector.load %arg13[%c0_55, %c0_56, %c0_57] : memref<1x1x128xf32, #tpu.memory_space<vmem>>, vector<1x1x128xf32>
    %150 = vector.shape_cast %149 : vector<1x1x128xf32> to vector<1x128xf32>
    %151 = vector.broadcast %150 : vector<1x128xf32> to vector<8x128xf32>
    %152 = arith.addf %148, %151 : vector<8x128xf32>
    %cst_58 = arith.constant 5.000000e-01 : f32
    %153 = vector.broadcast %cst_58 : f32 to vector<8x128xf32>
    %154 = arith.mulf %153, %152 : vector<8x128xf32>
    %cst_59 = arith.constant 0.707106769 : f32
    %155 = vector.broadcast %cst_59 : f32 to vector<8x128xf32>
    %156 = arith.mulf %152, %155 : vector<8x128xf32>
    %157 = math.erf %156 : vector<8x128xf32>
    %cst_60 = arith.constant 1.000000e+00 : f32
    %158 = vector.broadcast %cst_60 : f32 to vector<8x128xf32>
    %159 = arith.addf %158, %157 : vector<8x128xf32>
    %160 = arith.mulf %154, %159 : vector<8x128xf32>
    %161 = arith.truncf %160 : vector<8x128xf32> to vector<8x128xbf16>
    %c0_61 = arith.constant 0 : index
    %c0_62 = arith.constant 0 : index
    %c0_63 = arith.constant 0 : index
    %162 = vector.load %arg14[%c0_61, %c0_62, %c0_63] : memref<1x128x32xbf16, #tpu.memory_space<vmem>>, vector<1x128x32xbf16>
    %163 = vector.shape_cast %162 : vector<1x128x32xbf16> to vector<128x32xbf16>
    %cst_64 = arith.constant dense<0.000000e+00> : vector<8x32xf32>
    %164 = tpu.matmul %161, %163, %cst_64 {dimension_numbers = #tpu.dot_dimension_numbers<[1], [0], [0], [1], [0, 0, 1, 1], [], []>} : vector<8x128xbf16>, vector<128x32xbf16>, vector<8x32xf32> -> vector<8x32xf32>
    %c0_65 = arith.constant 0 : index
    %c0_66 = arith.constant 0 : index
    %c0_67 = arith.constant 0 : index
    %165 = vector.load %arg15[%c0_65, %c0_66, %c0_67] : memref<1x1x32xf32, #tpu.memory_space<vmem>>, vector<1x1x32xf32>
    %166 = vector.shape_cast %165 : vector<1x1x32xf32> to vector<1x32xf32>
    %167 = vector.broadcast %166 : vector<1x32xf32> to vector<8x32xf32>
    %168 = arith.addf %164, %167 : vector<8x32xf32>
    %169 = arith.addf %118, %168 : vector<8x32xf32>
    %170 = vector.shape_cast %169 : vector<8x32xf32> to vector<1x8x32xf32>
    %c0_68 = arith.constant 0 : index
    %c0_69 = arith.constant 0 : index
    %c0_70 = arith.constant 0 : index
    %171 = vector.load %arg16[%c0_68, %c0_69, %c0_70] : memref<1x8x32xf32, #tpu.memory_space<vmem>>, vector<1x8x32xf32>
    tpu.vector_store %arg16[%c0_68, %c0_69, %c0_70], %170 {strides = array<i32>} : memref<1x8x32xf32, #tpu.memory_space<vmem>>, vector<1x8x32xf32>,
    return
  }
  func.func @transform_0(%arg0: i32, %arg1: i32) -> (i32, i32, i32) {
    %c0_i32 = arith.constant 0 : i32
    %c0_i32_0 = arith.constant 0 : i32
    %c0_i32_1 = arith.constant 0 : i32
    return %arg0, %c0_i32, %c0_i32_0 : i32, i32, i32
  }
  func.func @transform_1(%arg0: i32, %arg1: i32) -> (i32, i32, i32, i32) {
    %c0_i32 = arith.constant 0 : i32
    %c0_i32_0 = arith.constant 0 : i32
    %c0_i32_1 = arith.constant 0 : i32
    %c0_i32_2 = arith.constant 0 : i32
    return %arg0, %c0_i32, %c0_i32_0, %c0_i32_1 : i32, i32, i32, i32
  }
  func.func @transform_2(%arg0: i32, %arg1: i32) -> (i32, i32, i32) {
    %c0_i32 = arith.constant 0 : i32
    %c0_i32_0 = arith.constant 0 : i32
    %c0_i32_1 = arith.constant 0 : i32
    return %arg1, %c0_i32, %c0_i32_0 : i32, i32, i32
  }
  func.func @transform_3(%arg0: i32, %arg1: i32) -> (i32, i32, i32) {
    %c0_i32 = arith.constant 0 : i32
    %c0_i32_0 = arith.constant 0 : i32
    %c0_i32_1 = arith.constant 0 : i32
    return %arg1, %c0_i32, %c0_i32_0 : i32, i32, i32
  }
  func.func @transform_4(%arg0: i32, %arg1: i32) -> (i32, i32, i32) {
    %c0_i32 = arith.constant 0 : i32
    %c0_i32_0 = arith.constant 0 : i32
    %c0_i32_1 = arith.constant 0 : i32
    return %arg1, %c0_i32, %c0_i32_0 : i32, i32, i32
  }
  func.func @transform_5(%arg0: i32, %arg1: i32) -> (i32, i32, i32) {
    %c0_i32 = arith.constant 0 : i32
    %c0_i32_0 = arith.constant 0 : i32
    %c0_i32_1 = arith.constant 0 : i32
    return %arg1, %c0_i32, %c0_i32_0 : i32, i32, i32
  }
  func.func @transform_6(%arg0: i32, %arg1: i32) -> (i32, i32, i32) {
    %c0_i32 = arith.constant 0 : i32
    %c0_i32_0 = arith.constant 0 : i32
    %c0_i32_1 = arith.constant 0 : i32
    return %arg1, %c0_i32, %c0_i32_0 : i32, i32, i32
  }
  func.func @transform_7(%arg0: i32, %arg1: i32) -> (i32, i32, i32) {
    %c0_i32 = arith.constant 0 : i32
    %c0_i32_0 = arith.constant 0 : i32
    %c0_i32_1 = arith.constant 0 : i32
    return %arg1, %c0_i32, %c0_i32_0 : i32, i32, i32
  }
  func.func @transform_8(%arg0: i32, %arg1: i32) -> (i32, i32, i32) {
    %c0_i32 = arith.constant 0 : i32
    %c0_i32_0 = arith.constant 0 : i32
    %c0_i32_1 = arith.constant 0 : i32
    return %arg1, %c0_i32, %c0_i32_0 : i32, i32, i32
  }
  func.func @transform_9(%arg0: i32, %arg1: i32) -> (i32, i32, i32) {
    %c0_i32 = arith.constant 0 : i32
    %c0_i32_0 = arith.constant 0 : i32
    %c0_i32_1 = arith.constant 0 : i32
    return %arg1, %c0_i32, %c0_i32_0 : i32, i32, i32
  }
  func.func @transform_10(%arg0: i32, %arg1: i32) -> (i32, i32, i32) {
    %c0_i32 = arith.constant 0 : i32
    %c0_i32_0 = arith.constant 0 : i32
    %c0_i32_1 = arith.constant 0 : i32
    return %arg1, %c0_i32, %c0_i32_0 : i32, i32, i32
  }
  func.func @transform_11(%arg0: i32, %arg1: i32) -> (i32, i32, i32) {
    %c0_i32 = arith.constant 0 : i32
    %c0_i32_0 = arith.constant 0 : i32
    %c0_i32_1 = arith.constant 0 : i32
    return %arg1, %c0_i32, %c0_i32_0 : i32, i32, i32
  }
  func.func @transform_12(%arg0: i32, %arg1: i32) -> (i32, i32, i32) {
    %c0_i32 = arith.constant 0 : i32
    %c0_i32_0 = arith.constant 0 : i32
    %c0_i32_1 = arith.constant 0 : i32
    return %arg1, %c0_i32, %c0_i32_0 : i32, i32, i32
  }
  func.func @transform_13(%arg0: i32, %arg1: i32) -> (i32, i32, i32) {
    %c0_i32 = arith.constant 0 : i32
    %c0_i32_0 = arith.constant 0 : i32
    %c0_i32_1 = arith.constant 0 : i32
    return %arg1, %c0_i32, %c0_i32_0 : i32, i32, i32
  }
  func.func @transform_14(%arg0: i32, %arg1: i32) -> (i32, i32, i32) {
    %c0_i32 = arith.constant 0 : i32
    %c0_i32_0 = arith.constant 0 : i32
    %c0_i32_1 = arith.constant 0 : i32
    return %arg0, %c0_i32, %c0_i32_0 : i32, i32, i32
  }
  func.func @transform_15(%arg0: i32, %arg1: i32) -> (i32, i32, i32, i32) {
    %c0_i32 = arith.constant 0 : i32
    %c0_i32_0 = arith.constant 0 : i32
    %c0_i32_1 = arith.constant 0 : i32
    %c0_i32_2 = arith.constant 0 : i32
    return %arg0, %c0_i32, %c0_i32_0, %c0_i32_1 : i32, i32, i32, i32
  }
}

</mosaic_0001>

<bundles_post_ra>
// kernel: unimol_encoder2.1
= control target key start
LH: loop header
LB: loop body
LE: loop exit
PB: predicated region body
PF: predicated region fallthrough
CT: control target
= control target key end

     0   :  { %s2260_s18 = smov 0   ;;  %s2262_s19 = smov 0   ;;  %s2587_s0 = inlined_call_operand.vmem [shape: f32[2,8,32], index: 0, kind: input, shape index: {}, may-alias: {0,14}]   ;;  %s2588_s1 = inlined_call_operand.vmem [shape: f32[2,4,8,8], index: 1, kind: input, shape index: {}, may-alias: {1,15}]   ;;  %s2589_s2 = inlined_call_operand.vmem [shape: f32[2,1,32], index: 2, kind: input, shape index: {}]   ;;  %s2590_s3 = inlined_call_operand.vmem [shape: f32[2,1,32], index: 3, kind: input, shape index: {}]   ;;  %s2591_s4 = inlined_call_operand.vmem [shape: bf16[2,32,96], index: 4, kind: input, shape index: {}]   ;;  %s2592_s5 = inlined_call_operand.vmem [shape: f32[2,1,96], index: 5, kind: input, shape index: {}]   ;;  %s2593_s6 = inlined_call_operand.vmem [shape: bf16[2,32,32], index: 6, kind: input, shape index: {}]   ;;  %s2594_s7 = inlined_call_operand.vmem [shape: f32[2,1,32], index: 7, kind: input, shape index: {}]   ;;  %s2595_s8 = inlined_call_operand.vmem [shape: f32[2,1,32], index: 8, kind: input, shape index: {}]   ;;  %s2596_s9 = inlined_call_operand.vmem [shape: f32[2,1,32], index: 9, kind: input, shape index: {}]   ;;  %s2597_s10 = inlined_call_operand.vmem [shape: bf16[2,32,128], index: 10, kind: input, shape index: {}]   ;;  %s2598_s11 = inlined_call_operand.vmem [shape: f32[2,1,128], index: 11, kind: input, shape index: {}]   ;;  %s2599_s12 = inlined_call_operand.vmem [shape: bf16[2,128,32], index: 12, kind: input, shape index: {}]   ;;  %s2600_s13 = inlined_call_operand.vmem [shape: f32[2,1,32], index: 13, kind: input, shape index: {}]   ;;  %s2601_s14 = inlined_call_operand.vmem [shape: f32[2,8,32], index: 14, kind: output, shape index: {0}, may-alias: {0,14}]   ;;  %s2602_s15 = inlined_call_operand.vmem [shape: f32[2,4,8,8], index: 15, kind: output, shape index: {1}, may-alias: {1,15}]  }
   0x1   :  { %2608 = sst [smem:[#allocation9_spill]] %s2587_s0  ;;  %s2264_s20 = smov 0  }
   0x2   :  { %2609 = sst [smem:[#allocation10_spill]] %s2588_s1  ;;  %s2266_s21 = smov 0  }
   0x3   :  { %2610 = sst [smem:[#allocation11_spill]] %s2591_s4  ;;  %s2268_s22 = smov 0  }
   0x4   :  { %2611 = sst [smem:[#allocation12_spill]] %s2593_s6 }
   0x5   :  { %2612 = sst [smem:[#allocation13_spill]] %s2594_s7 }
   0x6   :  { %2613 = sst [smem:[#allocation14_spill]] %s2596_s9 }
   0x7   :  { %2614 = sst [smem:[#allocation15_spill]] %s2597_s10 }
   0x8   :  { %2615 = sst [smem:[#allocation16_spill]] %s2599_s12 }
   0x9   :  { %2616 = sst [smem:[#allocation17_spill]] %s2600_s13 }
   0xa   :  { %2617 = sst [smem:[#allocation18_spill]] %s2601_s14 }
   0xb   :  { %2618 = sst [smem:[#allocation19_spill]] %s2602_s15 }
   0xc LB: > { %2619 = sst [smem:[#allocation2_spill]] %s2152_s18  ;;  %s35_s23 = sadd.s32 1, %s2160_s20  ;;  %s2168_s22 = sphi %s2268_s22, %s26_s22   ;;  %s2164_s21 = sphi %s2266_s21, %s2653_s21   ;;  %s2160_s20 = sphi %s2264_s20, %s2652_s20   ;;  %s2156_s19 = sphi %s2262_s19, %s2651_s19   ;;  %s2152_s18 = sphi %s2260_s18, %s2650_s18  }
   0xd   : > { %2620 = sst [smem:[#allocation3_spill]] %s2160_s20  ;;  %s38_s24 = sadd.s32 1, %s2164_s21 }
   0xe   : > { %2621 = sst [smem:[#allocation4_spill]] %s2164_s21  ;;  %p36_p0 = scmp.ge.s32.totalorder %s35_s23, 2 }
   0xf   : > { %2622 = sst [smem:[#allocation5_spill]] %s2168_s22  ;;  %p1860_p1 = scmp.ge.s32.totalorder %s2168_s22, 1 }
  0x10   : > { %p565_p2 = scmp.lt.s32.totalorder %s2168_s22, 5  ;;  %s2655_s23 = smov (%p36_p0, %s35_s23), 0 }
  0x11   : > { %2623 = sst [smem:[#allocation6_spill]] %s2655_s23  ;;  %s2657_s24 = smov (!%p36_p0, %s38_s24), %s2164_s21 }
  0x12   : > { %p566_p3 = pnand %p1860_p1, %p565_p2  ;;  %p40_p4 = scmp.ge.s32.totalorder %s2657_s24, 2 }
  0x14   : > { %s2659_s24 = smov (%p40_p4, %s2657_s24), 0  ;;  %569 = sbr.rel (%p566_p3) target bundleno = 2426 (0x97a), region = 76 }
  0x15   : > { %2624 = sst [smem:[#allocation7_spill]] %s2659_s24 }
  0x19   : > { %p665_p5 = scmp.lt.s32.totalorder %s2156_s19, 1  ;;  %p674_p6 = scmp.lt.s32.totalorder %s2152_s18, 1 }
  0x1a   : > { %s2625_s0 = sld [smem:[#allocation9_spill]] }
  0x1b   : > { %s2661_s19 = smov (!%p665_p5, %s2156_s19), 1  ;;  %s2626_s1 = sld [smem:[#allocation10_spill]] }
  0x1c   : > { %s2294_s25 = scalar_select %p674_p6, %s2152_s18, 1 }
  0x1d   : > { %s1861_s26 = sshll.u32 %s2661_s19, 3  ;;  %s1912_s27 = sshll.u32 %s2661_s19, 5 }
  0x1e   : > { %s1913_s14 = sshll.u32 %s2294_s25, 4  ;;  %s2627_s4 = sld [smem:[#allocation11_spill]] }
  0x1f   : > { %s2628_s6 = sld [smem:[#allocation12_spill]] }
  0x20   : > { %s668_s30 = scalar_lea.vmem %s2625_s0, %s1861_s26  ;;  %s2632_s10 = sld [smem:[#allocation15_spill]] }
  0x21   : > { %s673_s24 = scalar_lea.vmem %s2626_s1, %s1912_s27  ;;  %s2633_s18 = sld [smem:[#allocation16_spill]] }
  0x22   : > { %s2634_s20 = sld [smem:[#allocation17_spill]] }
  0x23   : > { %s2635_s9 = sld [smem:[#allocation18_spill]] }
  0x24   : > { %s2318_s0 = scalar_lea.vmem %s2627_s4, %s1913_s14  ;;  %s2637_s17 = sld [smem:[#allocation2_spill]] }
  0x25   : > { %s2323_s1 = scalar_lea.vmem %s2628_s6, %s1913_s14  ;;  %s709_s6 = scalar_lea.vmem %s2598_s11, %s2294_s25 }
  0x26   : > { %2629 = sst [smem:[#allocation8_spill]] %s2323_s1  ;;  %s2340_s4 = scalar_lea.vmem %s2632_s10, %s1913_s14 }
  0x27   : > { %s1916_s1 = sshll.u32 %s2294_s25, 6  ;;  %s2636_s10 = sld [smem:[#allocation19_spill]] }
  0x28   : > { %s2350_s7 = scalar_lea.vmem %s2633_s18, %s1916_s1  ;;  %s717_s13 = scalar_lea.vmem %s2634_s20, %s2294_s25 }
  0x29   : > { %s2359_s28 = scalar_lea.vmem %s2635_s9, %s1861_s26 }
  0x2a   : > { %p1875_p7 = scmp.ne.s32.totalorder %s2637_s17, 0 }
  0x2c   : > { %731 = sbr.rel (%p1875_p7) target bundleno = 53 (0x35), region = 80 }
  0x2d   : > { %s2364_s16 = scalar_lea.vmem %s2636_s10, %s1912_s27 }
  0x31   : > { %v732_v0 = vld [vmem:[%s668_s30] sm:$0xff]  ;;  %vm733_vm0 = vcmask 261120   ;;  %v736_v2 = vld [vmem:[%s673_s24 + $0x8] sm:$0xff]  ;;  %vm739_vm1 = vcmask 64512   ;;  %v737_v3 = vld [vmem:[%s673_s24 + $0x10] sm:$0xff] }
  0x32   : > { %v735_v1 = vld [vmem:[%s673_s24] sm:$0xff]  ;;  %734 = vst.msk [vmem:[%s2359_s28] sm:$0xff] %vm733_vm0, %v732_v0  ;;  %v738_v4 = vld [vmem:[%s673_s24 + $0x18] sm:$0xff] }
  0x33   : > { %740 = vst.msk [vmem:[%s2364_s16] sm:$0xff] %vm739_vm1, %v735_v1  ;;  %741 = vst.msk [vmem:[%s2364_s16 + $0x8] sm:$0xff] %vm739_vm1, %v736_v2 }
  0x34   : > { %742 = vst.msk [vmem:[%s2364_s16 + $0x10] sm:$0xff] %vm739_vm1, %v737_v3  ;;  %743 = vst.msk [vmem:[%s2364_s16 + $0x18] sm:$0xff] %vm739_vm1, %v738_v4 }
  0x35 PF: > { %vm747_vm2 = vcmask 261120   ;;  %v2094_v12 = vld [vmem:[%s2318_s0 + $0x8] sm:$0xff]   ;;  %v2170_v13 = vmov 0.0   ;;  %vm2171_vm3 = vmmov 0   ;;  %v2095_v14 = vld [vmem:[%s2318_s0] sm:$0xff]   ;;  %s2638_s0 = scalar_lea.vmem %s2589_s2, %s2294_s25  ;;  %s2639_s20 = scalar_lea.vmem %s2590_s3, %s2294_s25  ;;  %vm864_vm4 = vcmask 64512  }
  0x36   : > { %1952 = vmatprep.subr.bf16.mxu0 %v2170_v13  ;;  %1956 = vmatprep.mubr.msk.bf16.mxu0 %vm2171_vm3, %v2170_v13  ;;  %v1876_v19 = vld [vmem:[%s2638_s0] ss:$0 sm:$0xff]  ;;  %s2640_s27 = scalar_lea.vmem %s2592_s5, %s2294_s25  ;;  %s2172_s30 = smov 104  }
  0x37   : > { %1953 = vmatpush3.bf16.msra.mxu0 %v2094_v12  ;;  %1972 = vmatprep.subr.bf16.mxu1 %v2170_v13  ;;  %v1877_v21 = vld [vmem:[%s2639_s20] ss:$0 sm:$0xff]  ;;  %s2173_s18 = smov 120   ;;  %s2174_s21 = smov 112  }
  0x38   : > { %1954 = vmatprep.subr.bf16.mxu0 %v2170_v13  ;;  %1974 = vmatprep.mubr.msk.bf16.mxu1 %vm2171_vm3, %v2170_v13  ;;  %v1878_v25 = vld [vmem:[%s2640_s27] ss:$0 sm:$0xff]  ;;  %s2175_s23 = smov 96   ;;  %s2641_s15 = sld [smem:[#allocation2_spill]] }
  0x39   : > { %v2373_v5 = vld [vmem:[%s2359_s28] sm:$0xff] }
  0x3a   : > { %v748_v6 = vsel %vm747_vm2, %v2373_v5, 0.0  ;;  %v857_v46 = vld [vmem:[%s2364_s16] sm:$0xff]  ;;  %v858_v52 = vld [vmem:[%s2364_s16 + $0x8] sm:$0xff] }
  0x3b   : > { %749 = vadd.xlane.f32.xlu0 %v748_v6  ;;  %1955 = vmatpush3.bf16.msra.mxu0 %v2095_v14  ;;  %v859_v56 = vld [vmem:[%s2364_s16 + $0x10] sm:$0xff]  ;;  %v860_v62 = vld [vmem:[%s2364_s16 + $0x18] sm:$0xff] }
  0x3c   : > { %1960 = vmatprep.subr.bf16.mxu0 %v2170_v13 }
  0x3e   : > { %p1886_p8 = scmp.ne.s32.totalorder %s2641_s15, 1 }
  0xc4   : > { %v750_v7 = vpop.xlane.xlu0 %749 }
  0xc5   : > { %v752_v8 = vmul.f32 0.03125, %v750_v7 }
  0xc7   : > { %v753_v9 = vsub.f32 %v2373_v5, %v752_v8 }
  0xc9   : > { %v754_v10 = vmul.f32 %v753_v9, %v753_v9 }
  0xcb   : > { %v755_v11 = vsel %vm747_vm2, %v754_v10, 0.0 }
  0xcc   : > { %756 = vadd.xlane.f32.xlu0 %v755_v11 }
 0x155   : > { %v757_v15 = vpop.xlane.xlu0 %756 }
 0x156   : > { %v758_v16 = vmul.f32 0.03125, %v757_v15 }
 0x158   : > { %v759_v17 = vadd.f32 1e-05, %v758_v16 }
 0x15a   : > { %2096 = vrsqrt.f32 %v759_v17 }
 0x167   : > { %v2097_v18 = vpop.eup %2096 }
 0x168   : > { %v761_v20 = vmul.f32 %v2097_v18, %v753_v9 }
 0x16a   : > { %v768_v22 = vmul.f32 %v1876_v19, %v761_v20 }
 0x16c   : > { %v775_v23 = vadd.f32 %v1877_v21, %v768_v22 }
 0x16e   : > { %v776_v24 = vpack.c.bf16 %v775_v23, %v775_v23 }
 0x170   : > { %1957 = vmatmul.mubr.msk.bf16.vlgmr.msra.gmra.mxu0 %vm747_vm2, %v776_v24 }
 0x171   : > { %1962 = vmatprep.mubr.msk.bf16.mxu0 %vm2171_vm3, %v2170_v13 }
 0x230   : > { %v837_v26 = vpop.f32.mrf.mxu0 }
 0x231   : > { %v838_v27 = vadd.f32 %v1878_v25, %v837_v26 }
 0x232   : > { %v1958_v28 = vpop.f32.mrf.mxu0 }
 0x233   : > { %850 = vrot.lane.b32.xlu0 %v838_v27, %s2172_s30  ;;  %844 = vrot.lane.b32.xlu1 %v838_v27, %s2173_s18  ;;  %v2407_v31 = vpack.c.bf16 %v838_v27, %v838_v27 }
 0x234   : > { %v840_v29 = vpop.f32.mrf.mxu0 }
 0x236   : > { %v1959_v30 = vpop.f32.mrf.mxu0 }
 0x237   : > { %847 = vrot.lane.b32.xlu1 %v838_v27, %s2174_s21 }
 0x23b   : > { %862 = vrot.lane.b32.xlu1 %v2407_v31, %s2175_s23 }
 0x2a5   : > { %v845_v32 = vpop.permute.xlu1 %844  ;;  %v851_v36 = vpop.permute.xlu0 %850 }
 0x2a6   : > { %v2410_v33 = vpack.c.bf16 %v845_v32, %v845_v32  ;;  %v2416_v38 = vpack.c.bf16 %v851_v36, %v851_v36 }
 0x2a8   : > { %912 = vrot.lane.b32.xlu1 %v2410_v33, %s2175_s23 }
 0x2a9   : > { %v848_v34 = vpop.permute.xlu1 %847 }
 0x2aa   : > { %v2413_v35 = vpack.c.bf16 %v848_v34, %v848_v34 }
 0x2ac   : > { %961 = vrot.lane.b32.xlu1 %v2413_v35, %s2175_s23 }
 0x2ad   : > { %v863_v37 = vpop.permute.xlu1 %862 }
 0x2ae   : > { %v869_v39 = vsel %vm864_vm4, %v863_v37, 0 }
 0x2af   : > { %1961 = vmatpush3.bf16.xpose.msra.mxu0 %v869_v39 }
 0x2b0   : > { %1010 = vrot.lane.b32.xlu1 %v2416_v38, %s2175_s23  ;;  %1966 = vmatprep.subr.bf16.mxu0 %v2170_v13 }
 0x2b6   : > { %1963 = vmatmul.mubr.msk.bf16.vlgmr.msra.gmra.mxu0 %vm864_vm4, %v2407_v31 }
 0x2b7   : > { %1968 = vmatprep.mubr.msk.bf16.mxu0 %vm2171_vm3, %v2170_v13 }
 0x31a   : > { %v913_v40 = vpop.permute.xlu1 %912 }
 0x31b   : > { %v918_v41 = vsel %vm864_vm4, %v913_v40, 0 }
 0x31c   : > { %1967 = vmatpush3.bf16.xpose.msra.mxu0 %v918_v41 }
 0x31d   : > { %1978 = vmatprep.subr.bf16.mxu0 %v2170_v13 }
 0x31e   : > { %v962_v42 = vpop.permute.xlu1 %961 }
 0x31f   : > { %v967_v43 = vsel %vm864_vm4, %v962_v42, 0 }
 0x320   : > { %1973 = vmatpush3.bf16.xpose.msra.mxu1 %v967_v43 }
 0x322   : > { %v1011_v44 = vpop.permute.xlu1 %1010 }
 0x323   : > { %v1016_v45 = vsel %vm864_vm4, %v1011_v44, 0  ;;  %1969 = vmatmul.mubr.msk.bf16.vlgmr.msra.gmra.mxu0 %vm864_vm4, %v2410_v33 }
 0x324   : > { %1979 = vmatpush3.bf16.xpose.msra.mxu0 %v1016_v45  ;;  %1980 = vmatprep.mubr.msk.bf16.mxu0 %vm2171_vm3, %v2170_v13 }
 0x327   : > { %1975 = vmatmul.mubr.msk.bf16.vlgmr.msra.gmra.mxu1 %vm864_vm4, %v2413_v35 }
 0x32b   : > { %1981 = vmatmul.mubr.msk.bf16.vlgmr.msra.gmra.mxu0 %vm864_vm4, %v2416_v38 }
 0x376   : > { %v905_v47 = vpop.f32.mrf.mxu0 }
 0x377   : > { %v2438_v48 = vadd.f32 %v905_v47, %v857_v46 }
 0x378   : > { %v1964_v49 = vpop.f32.mrf.mxu0 }
 0x379   : > { %1058 = vst.msk [vmem:[%s2364_s16] sm:$0xff] %vm864_vm4, %v2438_v48 }
 0x37a   : > { %v908_v50 = vpop.f32.mrf.mxu0 }
 0x37c   : > { %v1965_v51 = vpop.f32.mrf.mxu0 }
 0x3e3   : > { %v954_v53 = vpop.f32.mrf.mxu0 }
 0x3e4   : > { %v2444_v54 = vadd.f32 %v954_v53, %v858_v52 }
 0x3e5   : > { %v1970_v55 = vpop.f32.mrf.mxu0 }
 0x3e6   : > { %1059 = vst.msk [vmem:[%s2364_s16 + $0x8] sm:$0xff] %vm864_vm4, %v2444_v54 }
 0x3e7   : > { %v957_v57 = vpop.f32.mrf.mxu0  ;;  %v1003_v58 = vpop.f32.mrf.mxu1 }
 0x3e8   : > { %v1004_v59 = vadd.f32 %v1003_v58, %v859_v56 }
 0x3e9   : > { %v1971_v60 = vpop.f32.mrf.mxu0  ;;  %v1976_v61 = vpop.f32.mrf.mxu1 }
 0x3ea   : > { %1060 = vst.msk [vmem:[%s2364_s16 + $0x10] sm:$0xff] %vm864_vm4, %v1004_v59 }
 0x3eb   : > { %v1006_v63 = vpop.f32.mrf.mxu1  ;;  %v1052_v0 = vpop.f32.mrf.mxu0 }
 0x3ec   : > { %v1053_v1 = vadd.f32 %v1052_v0, %v860_v62 }
 0x3ed   : > { %v1977_v2 = vpop.f32.mrf.mxu1  ;;  %v1982_v3 = vpop.f32.mrf.mxu0  ;;  %1065 = sbr.rel (%p1886_p8) target bundleno = 1019 (0x3fb), region = 84 }
 0x3ee   : > { %1061 = vst.msk [vmem:[%s2364_s16 + $0x18] sm:$0xff] %vm864_vm4, %v1053_v1 }
 0x3ef   : > { %v1055_v4 = vpop.f32.mrf.mxu0 }
 0x3f1   : > { %v1983_v6 = vpop.f32.mrf.mxu0 }
 0x3f2   : > { %v1066_v7 = vld [vmem:[%s2364_s16] sm:$0xff]  ;;  %v1067_v8 = vld [vmem:[%s2364_s16 + $0x8] sm:$0xff]  ;;  %v1068_v9 = vld [vmem:[%s2364_s16 + $0x10] sm:$0xff] }
 0x3f3   : > { %v1070_v10 = vand.u32 2147483647, %v1066_v7  ;;  %v1071_v11 = vand.u32 2147483647, %v1067_v8  ;;  %v1072_v12 = vand.u32 2147483647, %v1068_v9 }
 0x3f5   : > { %v1069_v14 = vld [vmem:[%s2364_s16 + $0x18] sm:$0xff]  ;;  %vm1074_vm5 = vcmp.eq.f32.partialorder %v1070_v10, inf  ;;  %vm1075_vm6 = vcmp.eq.f32.partialorder %v1071_v11, inf  ;;  %vm1076_vm7 = vcmp.eq.f32.partialorder %v1072_v12, inf }
 0x3f6   : > { %v1073_v15 = vand.u32 2147483647, %v1069_v14  ;;  %v1078_v16 = vsel %vm1074_vm5, 0.0, %v1066_v7  ;;  %v1079_v17 = vsel %vm1075_vm6, 0.0, %v1067_v8  ;;  %v1080_v18 = vsel %vm1076_vm7, 0.0, %v1068_v9 }
 0x3f7   : > { %1082 = vst.msk [vmem:[%s2364_s16] sm:$0xff] %vm864_vm4, %v1078_v16  ;;  %1083 = vst.msk [vmem:[%s2364_s16 + $0x8] sm:$0xff] %vm864_vm4, %v1079_v17 }
 0x3f8   : > { %1084 = vst.msk [vmem:[%s2364_s16 + $0x10] sm:$0xff] %vm864_vm4, %v1080_v18  ;;  %vm1077_vm8 = vcmp.eq.f32.partialorder %v1073_v15, inf }
 0x3f9   : > { %v1081_v19 = vsel %vm1077_vm8, 0.0, %v1069_v14 }
 0x3fa   : > { %1085 = vst.msk [vmem:[%s2364_s16 + $0x18] sm:$0xff] %vm864_vm4, %v1081_v19 }
 0x3fb PF: > { %v1086_v20 = vsel %vm864_vm4, %v2438_v48, -inf  ;;  %v1092_v21 = vsel %vm864_vm4, %v1004_v59, -inf  ;;  %v1089_v22 = vsel %vm864_vm4, %v2444_v54, -inf  ;;  %v1095_v23 = vsel %vm864_vm4, %v1053_v1, -inf  ;;  %1984 = vmatprep.subr.bf16.mxu1 %v2170_v13  ;;  %1990 = vmatprep.subr.bf16.mxu0 %v2170_v13  ;;  %s2176_s22 = smov 64   ;;  %s2642_s19 = sld [smem:[#allocation8_spill]] }
 0x3fc   : > { %1087 = vmax.xlane.f32.xlu0 %v1086_v20  ;;  %1093 = vmax.xlane.f32.xlu1 %v1092_v21  ;;  %vm1131_vm9 = vcmask 1043456   ;;  %s2177_s14 = smov 8   ;;  %s2178_s29 = smov 16   ;;  %vm1340_vm10 = vcmask 130048   ;;  %vm1342_vm11 = vcmask 195584  }
 0x3fd   : > { %1986 = vmatprep.mubr.msk.bf16.mxu1 %vm2171_vm3, %v2170_v13  ;;  %1992 = vmatprep.mubr.msk.bf16.mxu0 %vm2171_vm3, %v2170_v13  ;;  %s2179_s16 = smov 24   ;;  %s2643_s9 = sld [smem:[#allocation13_spill]] }
 0x3fe   : > { %s2645_s12 = scalar_lea.vmem %s2595_s8, %s2294_s25  ;;  %s2646_s26 = sld [smem:[#allocation14_spill]] }
 0x400   : > { %1090 = vmax.xlane.f32.xlu0 %v1089_v22  ;;  %1096 = vmax.xlane.f32.xlu1 %v1095_v23 }
 0x401   : > { %v2098_v58 = vld [vmem:[%s2642_s19 + $0x8] sm:$0xff]   ;;  %v2099_v60 = vld [vmem:[%s2642_s19] sm:$0xff]  }
 0x403   : > { %s2644_s0 = scalar_lea.vmem %s2643_s9, %s2294_s25 }
 0x404   : > { %s2647_s27 = scalar_lea.vmem %s2646_s26, %s2294_s25 }
 0x411   : > { %1175 = vrot.lane.b32.xlu1 %v2410_v33, %s2176_s22 }
 0x415   : > { %1223 = vrot.lane.b32.xlu1 %v2413_v35, %s2176_s22 }
 0x416   : > { %1126 = vrot.lane.b32.xlu0 %v2407_v31, %s2176_s22 }
 0x419   : > { %1271 = vrot.lane.b32.xlu1 %v2416_v38, %s2176_s22 }
 0x485   : > { %v1088_v24 = vpop.xlane.xlu0 %1087  ;;  %v1094_v25 = vpop.xlane.xlu1 %1093 }
 0x486   : > { %v1098_v26 = vsub.f32 %v2438_v48, %v1088_v24  ;;  %v1100_v27 = vsub.f32 %v1004_v59, %v1094_v25 }
 0x488   : > { %v1102_v28 = vmul.f32 1.442695, %v1098_v26  ;;  %v1106_v29 = vmul.f32 1.442695, %v1100_v27 }
 0x489   : > { %v1091_v30 = vpop.xlane.xlu0 %1090  ;;  %v1097_v32 = vpop.xlane.xlu1 %1096 }
 0x48a   : > { %2110 = vpow2.f32 %v1102_v28  ;;  %v1099_v34 = vsub.f32 %v2444_v54, %v1091_v30  ;;  %v1101_v36 = vsub.f32 %v1053_v1, %v1097_v32  ;;  %v1891_v32 = vld [vmem:[%s2644_s0] ss:$0 sm:$0xff] }
 0x48b   : > { %2112 = vpow2.f32 %v1106_v29 }
 0x48c   : > { %v1104_v33 = vmul.f32 1.442695, %v1099_v34  ;;  %v1108_v35 = vmul.f32 1.442695, %v1101_v36 }
 0x48d   : > { %v1176_v31 = vpop.permute.xlu1 %1175  ;;  %v1127_v37 = vpop.permute.xlu0 %1126 }
 0x48e   : > { %2114 = vpow2.f32 %v1104_v33  ;;  %v1133_v38 = vsel %vm1131_vm9, %v1127_v37, 0  ;;  %v1181_v39 = vsel %vm1131_vm9, %v1176_v31, 0 }
 0x48f   : > { %2116 = vpow2.f32 %v1108_v35  ;;  %1985 = vmatpush3.bf16.msra.mxu1 %v1133_v38  ;;  %1991 = vmatpush3.bf16.msra.mxu0 %v1181_v39 }
 0x490   : > { %1996 = vmatprep.subr.bf16.mxu1 %v2170_v13  ;;  %2002 = vmatprep.subr.bf16.mxu0 %v2170_v13 }
 0x491   : > { %v1224_v40 = vpop.permute.xlu1 %1223 }
 0x492   : > { %v1229_v43 = vsel %vm1131_vm9, %v1224_v40, 0 }
 0x495   : > { %v1272_v45 = vpop.permute.xlu1 %1271 }
 0x496   : > { %v1277_v49 = vsel %vm1131_vm9, %v1272_v45, 0  ;;  %v2102_v45 = vld [vmem:[%s2350_s7 + $0x38] sm:$0xff]  }
 0x497   : > { %v2111_v41 = vpop.eup %2110 }
 0x498   : > { %v2113_v42 = vpop.eup %2112  ;;  %v1122_v44 = vpack.c.bf16 %v2111_v41, %v2111_v41  ;;  %v1110_v55 = vsel %vm864_vm4, %v2111_v41, 0.0 }
 0x499   : > { %v1116_v46 = vsel %vm864_vm4, %v2113_v42, 0.0  ;;  %v1124_v53 = vpack.c.bf16 %v2113_v42, %v2113_v42 }
 0x49a   : > { %1987 = vmatmul.mubr.msk.bf16.vlgmr.msra.gmra.mxu1 %vm864_vm4, %v1122_v44  ;;  %1117 = vadd.xlane.f32.xlu1 %v1116_v46  ;;  %v2100_v44 = vld [vmem:[%s2340_s4 + $0x8] sm:$0xff]   ;;  %v2103_v46 = vld [vmem:[%s2350_s7 + $0x30] sm:$0xff]  }
 0x49b   : > { %v2115_v47 = vpop.eup %2114  ;;  %1997 = vmatpush3.bf16.msra.mxu1 %v1229_v43  ;;  %1998 = vmatprep.mubr.msk.bf16.mxu1 %vm2171_vm3, %v2170_v13 }
 0x49c   : > { %v2117_v48 = vpop.eup %2116  ;;  %v1113_v50 = vsel %vm864_vm4, %v2115_v47, 0.0  ;;  %v1123_v51 = vpack.c.bf16 %v2115_v47, %v2115_v47  ;;  %2008 = vmatprep.subr.bf16.mxu1 %v2170_v13 }
 0x49d   : > { %1114 = vadd.xlane.f32.xlu0 %v1113_v50  ;;  %v1119_v52 = vsel %vm864_vm4, %v2117_v48, 0.0  ;;  %v1125_v54 = vpack.c.bf16 %v2117_v48, %v2117_v48 }
 0x49e   : > { %1993 = vmatmul.mubr.msk.bf16.vlgmr.msra.gmra.mxu0 %vm864_vm4, %v1123_v51  ;;  %v1895_v51 = vld [vmem:[%s2645_s12] ss:$0 sm:$0xff] }
 0x49f   : > { %2003 = vmatpush3.bf16.msra.mxu0 %v1277_v49  ;;  %2004 = vmatprep.mubr.msk.bf16.mxu0 %vm2171_vm3, %v2170_v13 }
 0x4a0   : > { %2016 = vmatprep.subr.bf16.mxu0 %v2170_v13 }
 0x4a1   : > { %1120 = vadd.xlane.f32.xlu0 %v1119_v52 }
 0x4a2   : > { %1999 = vmatmul.mubr.msk.bf16.vlgmr.msra.gmra.mxu1 %vm864_vm4, %v1124_v53  ;;  %v1896_v53 = vld [vmem:[%s2647_s27] ss:$0 sm:$0xff] }
 0x4a3   : > { %2012 = vmatprep.mubr.msk.bf16.mxu1 %vm2171_vm3, %v2170_v13  ;;  %2009 = vmatpush3.bf16.msra.mxu1 %v2098_v58  ;;  %v2105_v58 = vld [vmem:[%s2350_s7 + $0x20] sm:$0xff]  }
 0x4a4   : > { %2010 = vmatprep.subr.bf16.mxu1 %v2170_v13 }
 0x4a5   : > { %1111 = vadd.xlane.f32.xlu0 %v1110_v55 }
 0x4a6   : > { %2005 = vmatmul.mubr.msk.bf16.vlgmr.msra.gmra.mxu0 %vm864_vm4, %v1125_v54 }
 0x4a7   : > { %2020 = vmatprep.mubr.msk.bf16.mxu0 %vm2171_vm3, %v2170_v13  ;;  %2011 = vmatpush3.bf16.msra.mxu1 %v2099_v60  ;;  %v2107_v60 = vld [vmem:[%s2350_s7 + $0x10] sm:$0xff]  }
 0x4a8   : > { %2024 = vmatprep.subr.bf16.mxu1 %v2170_v13  ;;  %2017 = vmatpush3.bf16.msra.mxu0 %v2100_v44 }
 0x4a9   : > { %2018 = vmatprep.subr.bf16.mxu0 %v2170_v13 }
 0x523   : > { %v1118_v57 = vpop.xlane.xlu1 %1117 }
 0x526   : > { %v1115_v56 = vpop.xlane.xlu0 %1114 }
 0x527   : > { %2118 = vrcp.f32 %v1115_v56 }
 0x528   : > { %2120 = vrcp.f32 %v1118_v57  ;;  %v2104_v57 = vld [vmem:[%s2350_s7 + $0x28] sm:$0xff]  }
 0x52a   : > { %v1121_v59 = vpop.xlane.xlu0 %1120 }
 0x52b   : > { %2122 = vrcp.f32 %v1121_v59  ;;  %v2106_v59 = vld [vmem:[%s2350_s7 + $0x18] sm:$0xff]  }
 0x52e   : > { %v1112_v21 = vpop.xlane.xlu0 %1111 }
 0x52f   : > { %2124 = vrcp.f32 %v1112_v21 }
 0x534   : > { %v2119_v63 = vpop.eup %2118 }
 0x535   : > { %v2121_v6 = vpop.eup %2120 }
 0x538   : > { %v2123_v12 = vpop.eup %2122 }
 0x53c   : > { %v2125_v22 = vpop.eup %2124 }
 0x55a   : > { %v1169_v61 = vpop.f32.mrf.mxu1 }
 0x55b   : > { %v1323_v25 = vmul.f32 %v2125_v22, %v1169_v61  ;;  %v2108_v61 = vld [vmem:[%s2350_s7 + $0x8] sm:$0xff]  }
 0x55c   : > { %v1988_v62 = vpop.f32.mrf.mxu1 }
 0x55d   : > { %v2109_v62 = vld [vmem:[%s2350_s7] sm:$0xff]  }
 0x55e   : > { %v1172_v0 = vpop.f32.mrf.mxu1  ;;  %v1217_v1 = vpop.f32.mrf.mxu0 }
 0x55f   : > { %v1324_v2 = vmul.f32 %v2119_v63, %v1217_v1  ;;  %v1897_v63 = vld [vmem:[%s709_s6] ss:$0 sm:$0xff] }
 0x560   : > { %v1989_v3 = vpop.f32.mrf.mxu1  ;;  %v1994_v4 = vpop.f32.mrf.mxu0 }
 0x561   : > { %1328 = vrot.lane.b32.xlu0 %v1324_v2, %s2177_s14 }
 0x562   : > { %v1220_v7 = vpop.f32.mrf.mxu0  ;;  %v1265_v8 = vpop.f32.mrf.mxu1 }
 0x563   : > { %v1325_v9 = vmul.f32 %v2121_v6, %v1265_v8 }
 0x564   : > { %v1995_v10 = vpop.f32.mrf.mxu0  ;;  %v2000_v11 = vpop.f32.mrf.mxu1 }
 0x565   : > { %1332 = vrot.lane.b32.xlu1 %v1325_v9, %s2178_s29  ;;  %v1901_v11 = vld [vmem:[%s717_s13] ss:$0 sm:$0xff] }
 0x566   : > { %v1268_v14 = vpop.f32.mrf.mxu1  ;;  %v1313_v15 = vpop.f32.mrf.mxu0 }
 0x567   : > { %v1326_v16 = vmul.f32 %v2123_v12, %v1313_v15 }
 0x568   : > { %v2001_v17 = vpop.f32.mrf.mxu1  ;;  %v2006_v18 = vpop.f32.mrf.mxu0 }
 0x569   : > { %1336 = vrot.lane.b32.xlu1 %v1326_v16, %s2179_s16 }
 0x56a   : > { %v1316_v19 = vpop.f32.mrf.mxu0 }
 0x56c   : > { %v2007_v20 = vpop.f32.mrf.mxu0 }
 0x5d3   : > { %v1329_v23 = vpop.permute.xlu0 %1328 }
 0x5d4   : > { %v1339_v26 = vsel %vm864_vm4, %v1323_v25, %v1329_v23 }
 0x5d7   : > { %v1333_v24 = vpop.permute.xlu1 %1332 }
 0x5d8   : > { %v1341_v27 = vsel %vm1340_vm10, %v1339_v26, %v1333_v24 }
 0x5db   : > { %v1337_v28 = vpop.permute.xlu1 %1336 }
 0x5dc   : > { %v1343_v29 = vsel %vm1342_vm11, %v1341_v27, %v1337_v28 }
 0x5dd   : > { %v1344_v30 = vpack.c.bf16 %v1343_v29, %v1343_v29 }
 0x5df   : > { %2013 = vmatmul.mubr.msk.bf16.vlgmr.msra.gmra.mxu1 %vm747_vm2, %v1344_v30 }
 0x5e0   : > { %2040 = vmatprep.mubr.msk.bf16.mxu1 %vm2171_vm3, %v2170_v13  ;;  %2025 = vmatpush3.bf16.msra.mxu1 %v2102_v45 }
 0x5e1   : > { %2026 = vmatprep.subr.bf16.mxu1 %v2170_v13 }
 0x5e4   : > { %2027 = vmatpush3.bf16.msra.mxu1 %v2103_v46 }
 0x5e5   : > { %2028 = vmatprep.subr.bf16.mxu1 %v2170_v13 }
 0x5e8   : > { %2029 = vmatpush3.bf16.msra.mxu1 %v2104_v57 }
 0x5e9   : > { %2030 = vmatprep.subr.bf16.mxu1 %v2170_v13 }
 0x5ec   : > { %2031 = vmatpush3.bf16.msra.mxu1 %v2105_v58 }
 0x5ed   : > { %2032 = vmatprep.subr.bf16.mxu1 %v2170_v13 }
 0x5f0   : > { %2033 = vmatpush3.bf16.msra.mxu1 %v2106_v59 }
 0x5f1   : > { %2034 = vmatprep.subr.bf16.mxu1 %v2170_v13 }
 0x5f4   : > { %2035 = vmatpush3.bf16.msra.mxu1 %v2107_v60 }
 0x5f5   : > { %2036 = vmatprep.subr.bf16.mxu1 %v2170_v13 }
 0x5f8   : > { %2037 = vmatpush3.bf16.msra.mxu1 %v2108_v61 }
 0x5f9   : > { %2038 = vmatprep.subr.bf16.mxu1 %v2170_v13 }
 0x5fc   : > { %2039 = vmatpush3.bf16.msra.mxu1 %v2109_v62 }
 0x69f   : > { %v1405_v34 = vpop.f32.mrf.mxu1 }
 0x6a0   : > { %v1406_v36 = vadd.f32 %v1891_v32, %v1405_v34 }
 0x6a1   : > { %v2014_v33 = vpop.f32.mrf.mxu1 }
 0x6a2   : > { %v2524_v35 = vadd.f32 %v1406_v36, %v2373_v5  ;;  %v2101_v5 = vld [vmem:[%s2340_s4] sm:$0xff]  }
 0x6a3   : > { %v1408_v31 = vpop.f32.mrf.mxu1  ;;  %2019 = vmatpush3.bf16.msra.mxu0 %v2101_v5 }
 0x6a4   : > { %v1414_v37 = vsel %vm747_vm2, %v2524_v35, 0.0 }
 0x6a5   : > { %1415 = vadd.xlane.f32.xlu1 %v1414_v37  ;;  %v2015_v38 = vpop.f32.mrf.mxu1 }
 0x72e   : > { %v1416_v39 = vpop.xlane.xlu1 %1415 }
 0x72f   : > { %v1417_v40 = vmul.f32 0.03125, %v1416_v39 }
 0x731   : > { %v1418_v41 = vsub.f32 %v2524_v35, %v1417_v40 }
 0x733   : > { %v1419_v42 = vmul.f32 %v1418_v41, %v1418_v41 }
 0x735   : > { %v1420_v43 = vsel %vm747_vm2, %v1419_v42, 0.0 }
 0x736   : > { %1421 = vadd.xlane.f32.xlu0 %v1420_v43 }
 0x7bf   : > { %v1422_v47 = vpop.xlane.xlu0 %1421 }
 0x7c0   : > { %v1423_v48 = vmul.f32 0.03125, %v1422_v47 }
 0x7c2   : > { %v1424_v49 = vadd.f32 1e-05, %v1423_v48 }
 0x7c4   : > { %2126 = vrsqrt.f32 %v1424_v49 }
 0x7d1   : > { %v2127_v50 = vpop.eup %2126 }
 0x7d2   : > { %v1426_v52 = vmul.f32 %v2127_v50, %v1418_v41 }
 0x7d4   : > { %v1433_v54 = vmul.f32 %v1895_v51, %v1426_v52 }
 0x7d6   : > { %v1440_v55 = vadd.f32 %v1896_v53, %v1433_v54 }
 0x7d8   : > { %v1441_v56 = vpack.c.bf16 %v1440_v55, %v1440_v55 }
 0x7da   : > { %2021 = vmatmul.mubr.msk.bf16.vlgmr.msra.gmra.mxu0 %vm747_vm2, %v1441_v56 }
 0x89a   : > { %v1502_v0 = vpop.f32.mrf.mxu0 }
 0x89b   : > { %v1503_v1 = vadd.f32 %v1897_v63, %v1502_v0 }
 0x89c   : > { %v2022_v2 = vpop.f32.mrf.mxu0 }
 0x89d   : > { %v1509_v3 = vmul.f32 0.70710677, %v1503_v1  ;;  %v1508_v8 = vmul.f32 0.5, %v1503_v1 }
 0x89e   : > { %v1505_v4 = vpop.f32.mrf.mxu0 }
 0x89f   : > { %2128 = verf.f32 %v1509_v3 }
 0x8a0   : > { %v2023_v6 = vpop.f32.mrf.mxu0 }
 0x8ac   : > { %v2129_v7 = vpop.eup %2128 }
 0x8ad   : > { %v1511_v9 = vadd.f32 1.0, %v2129_v7 }
 0x8af   : > { %v1512_v13 = vmul.f32 %v1511_v9, %v1508_v8 }
 0x8b1   : > { %v1513_v10 = vpack.c.bf16 %v1512_v13, %v1512_v13 }
 0x8b3   : > { %2041 = vmatmul.mubr.bf16.vlgmr.msra.gmra.mxu1 %v1513_v10 }
 0x973   : > { %v1619_v12 = vpop.f32.mrf.mxu1 }
 0x974   : > { %v1620_v14 = vadd.f32 %v1901_v11, %v1619_v12 }
 0x975   : > { %v2042_v15 = vpop.f32.mrf.mxu1 }
 0x976   : > { %v1625_v16 = vadd.f32 %v1620_v14, %v2524_v35 }
 0x977   : > { %v1622_v17 = vpop.f32.mrf.mxu1 }
 0x978   : > { %1626 = vst.msk [vmem:[%s2359_s28] sm:$0xff] %vm747_vm2, %v1625_v16 }
 0x979   : > { %v2043_v18 = vpop.f32.mrf.mxu1 }
 0x97a PF: > { %s2649_s6 = sld [smem:[#allocation5_spill]] }
 0x97b   : > { %s2650_s18 = sld [smem:[#allocation3_spill]] }
 0x97c   : > { %s2651_s19 = sld [smem:[#allocation4_spill]] }
 0x97d   : > { %s2652_s20 = sld [smem:[#allocation6_spill]] }
 0x97e   : > { %s2653_s21 = sld [smem:[#allocation7_spill]] }
 0x980   : > { %s26_s22 = sadd.s32 1, %s2649_s6  }
 0x981   : > { %p23_p9 = scmp.ge.s32.totalorder %s26_s22, 6  }
 0x983   :  { %25 = sbr.rel (!%p23_p9) target bundleno = 12 (0xc), region = 165 }

</bundles_post_ra>
